<compile_context>
chip_gen: v7x
topology: tpu7x:2x2x1
jax: 0.10.0
libtpu: 0.0.40
codegen_flags: <defaults>
</compile_context>

<pallas_src>
import jax
import jax.numpy as jnp
import numpy as np
from jax.experimental import pallas as pl
from jax.experimental.pallas import tpu as pltpu


def bottleneck_kernel(x_ref, w1_ref, s1_ref, b1_ref,
                      w2u_ref, w2m_ref, w2d_ref, s2_ref, b2_ref,
                      w3_ref, s3_ref, b3_ref, o_ref):
    # x_ref : (NB, H, W*Cin)  bf16   lane-dense image rows, NB images per step
    # w1_ref: (W*Cin, W*P)    bf16   block-diagonal 1x1-conv weight
    # w2*   : (W*P, W*P)      bf16   banded 3x3-conv weights for ky = -1/0/+1
    # w3_ref: (W*P, W*Cout)   bf16   block-diagonal 1x1-conv weight
    # s*/b* : (1, W*C)        f32    per-channel BN scale/bias tiled along W
    # o_ref : (NB, H, W*Cout) f32
    nb, hgt, wci = x_ref.shape
    wp = w1_ref.shape[1]
    m = nb * hgt

    # conv1 (1x1, no bias) + bn1 + relu: one lane-dense MXU matmul, M = NB*H.
    x = x_ref[...].reshape(m, wci)                     # free leading-dim merge
    h1 = jnp.dot(x, w1_ref[...], preferred_element_type=jnp.float32)
    h1 = jnp.maximum(h1 * s1_ref[...] + b1_ref[...], 0.0)        # (M, W*P) f32

    # conv2 (3x3, stride=1, SAME, no bias) + bn2 + relu as three accumulating
    # banded dots.  ky row shifts = XLU rolls along the fused row axis; the
    # per-image boundary mask (local row 0 / H-1) supplies the SAME zero
    # padding and stops rows bleeding across images or wrapping around.
    row = jax.lax.broadcasted_iota(jnp.int32, (m, wp), 0) % hgt
    up = jnp.where(row == 0, 0.0, pltpu.roll(h1, shift=1, axis=0))        # h1[i-1]
    down = jnp.where(row == hgt - 1, 0.0, pltpu.roll(h1, shift=m - 1, axis=0))  # h1[i+1]
    h2 = (jnp.dot(h1.astype(jnp.bfloat16), w2m_ref[...],
                  preferred_element_type=jnp.float32)
          + jnp.dot(up.astype(jnp.bfloat16), w2u_ref[...],
                    preferred_element_type=jnp.float32)
          + jnp.dot(down.astype(jnp.bfloat16), w2d_ref[...],
                    preferred_element_type=jnp.float32))
    h2 = jnp.maximum(h2 * s2_ref[...] + b2_ref[...], 0.0)        # (M, W*P) f32

    # conv3 (1x1, no bias) + bn3, with the identity-shortcut doubling
    # (`h += shortcut(h)` => h = 2h) folded into s3/b3, then the final relu.
    h3 = jnp.dot(h2.astype(jnp.bfloat16), w3_ref[...],
                 preferred_element_type=jnp.float32)              # (M, W*Cout)
    o_ref[...] = jnp.maximum(h3 * s3_ref[...] + b3_ref[...], 0.0).reshape(nb, hgt, -1)


def _prepare_operands(params, W):
    """Lane-dense block/band weight matrices + tiled BN rows (runs once in XLA)."""
    w1, w2, w3 = params["w1"], params["w2"], params["w3"]
    Cin, P = w1.shape
    Cout = w3.shape[1]

    eye = jnp.eye(W, dtype=jnp.float32)
    # Block-diagonal 1x1-conv weights: rows index (w_in, ci), cols (w_out, co).
    w1b = jnp.einsum("uv,cp->ucvp", eye, w1).reshape(W * Cin, W * P)
    w3b = jnp.einsum("uv,cp->ucvp", eye, w3).reshape(W * P, W * Cout)

    # Banded matrices for the 3x3 conv, one per kernel row ky:
    #   B[ky][w_in*P+ci, x*P+co] = w2[ky, (w_in-x)+1, ci, co]  if |w_in-x| <= 1.
    # kx shifts + channel mixing are folded into the band; ky is handled in the
    # kernel by three accumulating dots against row-shifted activations.
    bands = []
    for ky in range(3):
        b = jnp.zeros((W * P, W * P), jnp.float32)
        for kx in range(3):
            shift = jnp.eye(W, k=-(kx - 1), dtype=jnp.float32)   # w_in - x == kx-1
            b = b + jnp.einsum("uv,cp->ucvp", shift,
                               w2[ky, kx]).reshape(W * P, W * P)
        bands.append(b.astype(jnp.bfloat16))

    def tile_row(v, c):
        return jnp.tile(v.reshape(1, c), (1, W))                 # (1, W*c) f32

    return dict(
        w1b=w1b.astype(jnp.bfloat16), w3b=w3b.astype(jnp.bfloat16),
        w2u=bands[0], w2m=bands[1], w2d=bands[2],
        s1r=tile_row(params["s1"], P), b1r=tile_row(params["b1"], P),
        s2r=tile_row(params["s2"], P), b2r=tile_row(params["b2"], P),
        # identity shortcut => output = relu(2 * bn3(conv3(h)))
        s3r=2.0 * tile_row(params["s3"], Cout),
        b3r=2.0 * tile_row(params["b3"], Cout),
    )


def bottleneck_forward_nhwc(x_nhwc, params):
    """NHWC (lane-dense) float32 in -> NHWC float32 out.  No layout transposes."""
    N, H, W, Cin = x_nhwc.shape
    P = params["w1"].shape[1]
    Cout = params["w3"].shape[1]
    assert Cin == Cout, "identity shortcut requires in_planes == 4 * planes"

    prep = _prepare_operands(params, W)
    WCi, WP, WCo = W * Cin, W * P, W * Cout

    # Fuse images into the matmul M dimension: NB images per grid step so that
    # M = NB*H is as large as possible (single step at the test size).
    nb = max(1, min(N, max(1, 256 // H)))
    while N % nb:
        nb -= 1
    grid = (N // nb,)

    # NHWC image rows as lane-dense (W*C)-wide vectors; bf16 for MXU/DMA.
    x_rows = x_nhwc.reshape(N, H, WCi).astype(jnp.bfloat16)

    def full(shape):
        return pl.BlockSpec(shape, lambda i: (0,) * len(shape))

    out_rows = pl.pallas_call(
        bottleneck_kernel,
        out_shape=jax.ShapeDtypeStruct((N, H, WCo), jnp.float32),
        grid_spec=pltpu.PrefetchScalarGridSpec(
            num_scalar_prefetch=0,
            grid=grid,
            in_specs=[
                pl.BlockSpec((nb, H, WCi), lambda i: (i, 0, 0)),
                full((WCi, WP)), full((1, WP)), full((1, WP)),
                full((WP, WP)), full((WP, WP)), full((WP, WP)),
                full((1, WP)), full((1, WP)),
                full((WP, WCo)), full((1, WCo)), full((1, WCo)),
            ],
            out_specs=pl.BlockSpec((nb, H, WCo), lambda i: (i, 0, 0)),
        ),
        compiler_params=pltpu.CompilerParams(
            dimension_semantics=("parallel",),
            vmem_limit_bytes=32 * 1024 * 1024),
    )(x_rows, prep["w1b"], prep["s1r"], prep["b1r"],
      prep["w2u"], prep["w2m"], prep["w2d"], prep["s2r"], prep["b2r"],
      prep["w3b"], prep["s3r"], prep["b3r"])

    return out_rows.reshape(N, H, W, Cout)


def bottleneck_forward(x_nchw, params):
    """NCHW boundary adapter (PyTorch layout).  Prefer the NHWC entry point:
    these two transposes are pure layout plumbing around the kernel."""
    out = bottleneck_forward_nhwc(jnp.transpose(x_nchw, (0, 2, 3, 1)), params)
    return jnp.transpose(out, (0, 3, 1, 2))


def init_params(key, in_planes, planes, eps=1e-5):
    """Deterministic synthetic parameters (conv weights + folded inference BN)."""
    expansion = 4
    cout = expansion * planes
    ks = jax.random.split(key, 15)

    def bn_fold(kg, kb, km, kv, c):
        gamma = 1.0 + 0.1 * jax.random.normal(kg, (c,), jnp.float32)
        beta = 0.1 * jax.random.normal(kb, (c,), jnp.float32)
        mean = 0.1 * jax.random.normal(km, (c,), jnp.float32)
        var = jax.nn.softplus(jax.random.normal(kv, (c,), jnp.float32)) + 0.5
        scale = gamma / jnp.sqrt(var + eps)
        bias = beta - mean * scale
        return scale, bias

    # w1: (Cin, P)      [torch (P, Cin, 1, 1) transposed]
    # w2: (3, 3, P, P)  HWIO  [torch (P, P, 3, 3) permuted to (ky, kx, ci, co)]
    # w3: (P, 4P)
    w1 = 0.1 * jax.random.normal(ks[0], (in_planes, planes), jnp.float32)
    w2 = 0.1 * jax.random.normal(ks[1], (3, 3, planes, planes), jnp.float32)
    w3 = 0.1 * jax.random.normal(ks[2], (planes, cout), jnp.float32)
    s1, b1 = bn_fold(ks[3], ks[4], ks[5], ks[6], planes)
    s2, b2 = bn_fold(ks[7], ks[8], ks[9], ks[10], planes)
    s3, b3 = bn_fold(ks[11], ks[12], ks[13], ks[14], cout)
    return dict(w1=w1, w2=w2, w3=w3, s1=s1, b1=b1, s2=s2, b2=b2, s3=s3, b3=b3)


def ref_forward_nhwc(x_nhwc, p):
    """Plain-JAX reference mirroring the kernel's bf16-input / f32-accum math."""
    xb = x_nhwc.astype(jnp.bfloat16)
    w1 = p["w1"].astype(jnp.bfloat16)
    w2 = p["w2"].astype(jnp.bfloat16)
    w3 = p["w3"].astype(jnp.bfloat16)
    h = jnp.einsum("nhwc,cp->nhwp", xb, w1, preferred_element_type=jnp.float32)
    h = jnp.maximum(h * p["s1"] + p["b1"], 0.0)
    h = jax.lax.conv_general_dilated(
        h.astype(jnp.bfloat16), w2, (1, 1), "SAME",
        dimension_numbers=("NHWC", "HWIO", "NHWC"),
        preferred_element_type=jnp.float32)
    h = jnp.maximum(h * p["s2"] + p["b2"], 0.0)
    h = jnp.einsum("nhwc,cp->nhwp", h.astype(jnp.bfloat16), w3,
                   preferred_element_type=jnp.float32)
    h = h * p["s3"] + p["b3"]
    return jnp.maximum(h + h, 0.0)   # h += shortcut(h) with identity shortcut


if __name__ == "__main__":
    key = jax.random.PRNGKey(0)
    in_planes, planes = 16, 4   # 4*planes == in_planes, stride=1 -> identity shortcut
    N, H, W = 2, 16, 16

    kx, kp = jax.random.split(key)
    x_nhwc = jax.random.normal(kx, (N, H, W, in_planes), jnp.float32)
    params = init_params(kp, in_planes, planes)

    out = jax.block_until_ready(bottleneck_forward_nhwc(x_nhwc, params))
    assert out.shape == (N, H, W, 4 * planes)

    ref = ref_forward_nhwc(x_nhwc, params)
    np.testing.assert_allclose(np.asarray(out), np.asarray(ref),
                               rtol=1e-2, atol=1e-2)
    print("KERNEL_OK")
</pallas_src>

<mosaic_0001>
module attributes {stable_mosaic.version = 11 : i64} {
  func.func @bottleneck_kernel(%arg0: i32, %arg1: memref<2x16x256xbf16, #tpu.memory_space<vmem>>, %arg2: memref<256x64xbf16, #tpu.memory_space<vmem>>, %arg3: memref<1x64xf32, #tpu.memory_space<vmem>>, %arg4: memref<1x64xf32, #tpu.memory_space<vmem>>, %arg5: memref<64x64xbf16, #tpu.memory_space<vmem>>, %arg6: memref<64x64xbf16, #tpu.memory_space<vmem>>, %arg7: memref<64x64xbf16, #tpu.memory_space<vmem>>, %arg8: memref<1x64xf32, #tpu.memory_space<vmem>>, %arg9: memref<1x64xf32, #tpu.memory_space<vmem>>, %arg10: memref<64x256xbf16, #tpu.memory_space<vmem>>, %arg11: memref<1x256xf32, #tpu.memory_space<vmem>>, %arg12: memref<1x256xf32, #tpu.memory_space<vmem>>, %arg13: memref<2x16x256xf32, #tpu.memory_space<vmem>>) attributes {dimension_semantics = [#tpu.dimension_semantics<parallel>], iteration_bounds = array<i64: 1>, scalar_prefetch = 0 : i64, scratch_operands = 0 : i64, tpu.core_type = #tpu.core_type<tc>, window_params = [{transform_indices = @transform_0, window_bounds = array<i64: 2, 16, 256>}, {pipeline_mode = #tpu.pipeline_mode<synchronous>, transform_indices = @transform_1, window_bounds = array<i64: 256, 64>}, {pipeline_mode = #tpu.pipeline_mode<synchronous>, transform_indices = @transform_2, window_bounds = array<i64: 1, 64>}, {pipeline_mode = #tpu.pipeline_mode<synchronous>, transform_indices = @transform_3, window_bounds = array<i64: 1, 64>}, {pipeline_mode = #tpu.pipeline_mode<synchronous>, transform_indices = @transform_4, window_bounds = array<i64: 64, 64>}, {pipeline_mode = #tpu.pipeline_mode<synchronous>, transform_indices = @transform_5, window_bounds = array<i64: 64, 64>}, {pipeline_mode = #tpu.pipeline_mode<synchronous>, transform_indices = @transform_6, window_bounds = array<i64: 64, 64>}, {pipeline_mode = #tpu.pipeline_mode<synchronous>, transform_indices = @transform_7, window_bounds = array<i64: 1, 64>}, {pipeline_mode = #tpu.pipeline_mode<synchronous>, transform_indices = @transform_8, window_bounds = array<i64: 1, 64>}, {pipeline_mode = #tpu.pipeline_mode<synchronous>, transform_indices = @transform_9, window_bounds = array<i64: 64, 256>}, {pipeline_mode = #tpu.pipeline_mode<synchronous>, transform_indices = @transform_10, window_bounds = array<i64: 1, 256>}, {pipeline_mode = #tpu.pipeline_mode<synchronous>, transform_indices = @transform_11, window_bounds = array<i64: 1, 256>}, {transform_indices = @transform_12, window_bounds = array<i64: 2, 16, 256>}]} {
    %c0 = arith.constant 0 : index
    %c0_0 = arith.constant 0 : index
    %c0_1 = arith.constant 0 : index
    %0 = vector.load %arg1[%c0, %c0_0, %c0_1] : memref<2x16x256xbf16, #tpu.memory_space<vmem>>, vector<2x16x256xbf16>
    %1 = vector.shape_cast %0 : vector<2x16x256xbf16> to vector<32x256xbf16>
    %c0_2 = arith.constant 0 : index
    %c0_3 = arith.constant 0 : index
    %2 = vector.load %arg2[%c0_2, %c0_3] : memref<256x64xbf16, #tpu.memory_space<vmem>>, vector<256x64xbf16>
    %cst = arith.constant dense<0.000000e+00> : vector<32x64xf32>
    %3 = tpu.matmul %1, %2, %cst {dimension_numbers = #tpu.dot_dimension_numbers<[1], [0], [0], [1], [0, 0, 1, 1], [], []>} : vector<32x256xbf16>, vector<256x64xbf16>, vector<32x64xf32> -> vector<32x64xf32>
    %c0_4 = arith.constant 0 : index
    %c0_5 = arith.constant 0 : index
    %4 = vector.load %arg3[%c0_4, %c0_5] : memref<1x64xf32, #tpu.memory_space<vmem>>, vector<1x64xf32>
    %5 = vector.broadcast %4 : vector<1x64xf32> to vector<32x64xf32>
    %6 = arith.mulf %3, %5 : vector<32x64xf32>
    %c0_6 = arith.constant 0 : index
    %c0_7 = arith.constant 0 : index
    %7 = vector.load %arg4[%c0_6, %c0_7] : memref<1x64xf32, #tpu.memory_space<vmem>>, vector<1x64xf32>
    %8 = vector.broadcast %7 : vector<1x64xf32> to vector<32x64xf32>
    %9 = arith.addf %6, %8 : vector<32x64xf32>
    %cst_8 = arith.constant 0.000000e+00 : f32
    %10 = vector.broadcast %cst_8 : f32 to vector<32x64xf32>
    %11 = arith.maximumf %9, %10 : vector<32x64xf32>
    %12 = tpu.iota {dimensions = array<i32: 0>} : vector<32x64xi32>
    %c16_i32 = arith.constant 16 : i32
    %c0_i32 = arith.constant 0 : i32
    %13 = arith.cmpi eq, %c16_i32, %c0_i32 : i32
    %c1_i32 = arith.constant 1 : i32
    %14 = arith.select %13, %c1_i32, %c16_i32 : i32
    %15 = vector.broadcast %14 : i32 to vector<32x64xi32>
    %16 = arith.remsi %12, %15 : vector<32x64xi32>
    %c0_i32_9 = arith.constant 0 : i32
    %17 = vector.broadcast %c0_i32_9 : i32 to vector<32x64xi32>
    %18 = arith.cmpi ne, %16, %17 : vector<32x64xi32>
    %c0_i32_10 = arith.constant 0 : i32
    %19 = vector.broadcast %c0_i32_10 : i32 to vector<32x64xi32>
    %20 = arith.cmpi slt, %16, %19 : vector<32x64xi32>
    %c0_i32_11 = arith.constant 0 : i32
    %21 = arith.cmpi slt, %14, %c0_i32_11 : i32
    %22 = vector.broadcast %21 : i1 to vector<32x64xi1>
    %23 = vector.broadcast %22 : vector<32x64xi1> to vector<32x64xi1>
    %24 = arith.xori %20, %23 : vector<32x64xi1>
    %25 = arith.andi %24, %18 : vector<32x64xi1>
    %26 = vector.broadcast %14 : i32 to vector<32x64xi32>
    %27 = arith.addi %16, %26 : vector<32x64xi32>
    %28 = arith.select %25, %27, %16 : vector<32x64xi1>, vector<32x64xi32>
    %c0_i32_12 = arith.constant 0 : i32
    %29 = vector.broadcast %c0_i32_12 : i32 to vector<32x64xi32>
    %30 = arith.cmpi eq, %28, %29 : vector<32x64xi32>
    %c1_i32_13 = arith.constant 1 : i32
    %31 = tpu.dynamic_rotate %11 by %c1_i32_13 dim 0 : vector<32x64xf32>, i32 -> vector<32x64xf32>
    %cst_14 = arith.constant 0.000000e+00 : f32
    %32 = vector.broadcast %cst_14 : f32 to vector<32x64xf32>
    %33 = arith.select %30, %32, %31 : vector<32x64xi1>, vector<32x64xf32>
    %c15_i32 = arith.constant 15 : i32
    %34 = vector.broadcast %c15_i32 : i32 to vector<32x64xi32>
    %35 = arith.cmpi eq, %28, %34 : vector<32x64xi32>
    %c31_i32 = arith.constant 31 : i32
    %36 = tpu.dynamic_rotate %11 by %c31_i32 dim 0 : vector<32x64xf32>, i32 -> vector<32x64xf32>
    %cst_15 = arith.constant 0.000000e+00 : f32
    %37 = vector.broadcast %cst_15 : f32 to vector<32x64xf32>
    %38 = arith.select %35, %37, %36 : vector<32x64xi1>, vector<32x64xf32>
    %39 = arith.truncf %11 : vector<32x64xf32> to vector<32x64xbf16>
    %c0_16 = arith.constant 0 : index
    %c0_17 = arith.constant 0 : index
    %40 = vector.load %arg6[%c0_16, %c0_17] : memref<64x64xbf16, #tpu.memory_space<vmem>>, vector<64x64xbf16>
    %cst_18 = arith.constant dense<0.000000e+00> : vector<32x64xf32>
    %41 = tpu.matmul %39, %40, %cst_18 {dimension_numbers = #tpu.dot_dimension_numbers<[1], [0], [0], [1], [0, 0, 1, 1], [], []>} : vector<32x64xbf16>, vector<64x64xbf16>, vector<32x64xf32> -> vector<32x64xf32>
    %42 = arith.truncf %33 : vector<32x64xf32> to vector<32x64xbf16>
    %c0_19 = arith.constant 0 : index
    %c0_20 = arith.constant 0 : index
    %43 = vector.load %arg5[%c0_19, %c0_20] : memref<64x64xbf16, #tpu.memory_space<vmem>>, vector<64x64xbf16>
    %cst_21 = arith.constant dense<0.000000e+00> : vector<32x64xf32>
    %44 = tpu.matmul %42, %43, %cst_21 {dimension_numbers = #tpu.dot_dimension_numbers<[1], [0], [0], [1], [0, 0, 1, 1], [], []>} : vector<32x64xbf16>, vector<64x64xbf16>, vector<32x64xf32> -> vector<32x64xf32>
    %45 = arith.addf %41, %44 : vector<32x64xf32>
    %46 = arith.truncf %38 : vector<32x64xf32> to vector<32x64xbf16>
    %c0_22 = arith.constant 0 : index
    %c0_23 = arith.constant 0 : index
    %47 = vector.load %arg7[%c0_22, %c0_23] : memref<64x64xbf16, #tpu.memory_space<vmem>>, vector<64x64xbf16>
    %cst_24 = arith.constant dense<0.000000e+00> : vector<32x64xf32>
    %48 = tpu.matmul %46, %47, %cst_24 {dimension_numbers = #tpu.dot_dimension_numbers<[1], [0], [0], [1], [0, 0, 1, 1], [], []>} : vector<32x64xbf16>, vector<64x64xbf16>, vector<32x64xf32> -> vector<32x64xf32>
    %49 = arith.addf %45, %48 : vector<32x64xf32>
    %c0_25 = arith.constant 0 : index
    %c0_26 = arith.constant 0 : index
    %50 = vector.load %arg8[%c0_25, %c0_26] : memref<1x64xf32, #tpu.memory_space<vmem>>, vector<1x64xf32>
    %51 = vector.broadcast %50 : vector<1x64xf32> to vector<32x64xf32>
    %52 = arith.mulf %49, %51 : vector<32x64xf32>
    %c0_27 = arith.constant 0 : index
    %c0_28 = arith.constant 0 : index
    %53 = vector.load %arg9[%c0_27, %c0_28] : memref<1x64xf32, #tpu.memory_space<vmem>>, vector<1x64xf32>
    %54 = vector.broadcast %53 : vector<1x64xf32> to vector<32x64xf32>
    %55 = arith.addf %52, %54 : vector<32x64xf32>
    %cst_29 = arith.constant 0.000000e+00 : f32
    %56 = vector.broadcast %cst_29 : f32 to vector<32x64xf32>
    %57 = arith.maximumf %55, %56 : vector<32x64xf32>
    %58 = arith.truncf %57 : vector<32x64xf32> to vector<32x64xbf16>
    %c0_30 = arith.constant 0 : index
    %c0_31 = arith.constant 0 : index
    %59 = vector.load %arg10[%c0_30, %c0_31] : memref<64x256xbf16, #tpu.memory_space<vmem>>, vector<64x256xbf16>
    %cst_32 = arith.constant dense<0.000000e+00> : vector<32x256xf32>
    %60 = tpu.matmul %58, %59, %cst_32 {dimension_numbers = #tpu.dot_dimension_numbers<[1], [0], [0], [1], [0, 0, 1, 1], [], []>} : vector<32x64xbf16>, vector<64x256xbf16>, vector<32x256xf32> -> vector<32x256xf32>
    %c0_33 = arith.constant 0 : index
    %c0_34 = arith.constant 0 : index
    %61 = vector.load %arg11[%c0_33, %c0_34] : memref<1x256xf32, #tpu.memory_space<vmem>>, vector<1x256xf32>
    %62 = vector.broadcast %61 : vector<1x256xf32> to vector<32x256xf32>
    %63 = arith.mulf %60, %62 : vector<32x256xf32>
    %c0_35 = arith.constant 0 : index
    %c0_36 = arith.constant 0 : index
    %64 = vector.load %arg12[%c0_35, %c0_36] : memref<1x256xf32, #tpu.memory_space<vmem>>, vector<1x256xf32>
    %65 = vector.broadcast %64 : vector<1x256xf32> to vector<32x256xf32>
    %66 = arith.addf %63, %65 : vector<32x256xf32>
    %cst_37 = arith.constant 0.000000e+00 : f32
    %67 = vector.broadcast %cst_37 : f32 to vector<32x256xf32>
    %68 = arith.maximumf %66, %67 : vector<32x256xf32>
    %69 = vector.shape_cast %68 : vector<32x256xf32> to vector<2x16x256xf32>
    %c0_38 = arith.constant 0 : index
    %c0_39 = arith.constant 0 : index
    %c0_40 = arith.constant 0 : index
    %70 = vector.load %arg13[%c0_38, %c0_39, %c0_40] : memref<2x16x256xf32, #tpu.memory_space<vmem>>, vector<2x16x256xf32>
    tpu.vector_store %arg13[%c0_38, %c0_39, %c0_40], %69 {strides = array<i32>} : memref<2x16x256xf32, #tpu.memory_space<vmem>>, vector<2x16x256xf32>,
    return
  }
  func.func @transform_0(%arg0: i32) -> (i32, i32, i32) {
    %c0_i32 = arith.constant 0 : i32
    %c0_i32_0 = arith.constant 0 : i32
    %c0_i32_1 = arith.constant 0 : i32
    return %arg0, %c0_i32, %c0_i32_0 : i32, i32, i32
  }
  func.func @transform_1(%arg0: i32) -> (i32, i32) {
    %c0_i32 = arith.constant 0 : i32
    %c0_i32_0 = arith.constant 0 : i32
    %c0_i32_1 = arith.constant 0 : i32
    return %c0_i32, %c0_i32_0 : i32, i32
  }
  func.func @transform_2(%arg0: i32) -> (i32, i32) {
    %c0_i32 = arith.constant 0 : i32
    %c0_i32_0 = arith.constant 0 : i32
    %c0_i32_1 = arith.constant 0 : i32
    return %c0_i32, %c0_i32_0 : i32, i32
  }
  func.func @transform_3(%arg0: i32) -> (i32, i32) {
    %c0_i32 = arith.constant 0 : i32
    %c0_i32_0 = arith.constant 0 : i32
    %c0_i32_1 = arith.constant 0 : i32
    return %c0_i32, %c0_i32_0 : i32, i32
  }
  func.func @transform_4(%arg0: i32) -> (i32, i32) {
    %c0_i32 = arith.constant 0 : i32
    %c0_i32_0 = arith.constant 0 : i32
    %c0_i32_1 = arith.constant 0 : i32
    return %c0_i32, %c0_i32_0 : i32, i32
  }
  func.func @transform_5(%arg0: i32) -> (i32, i32) {
    %c0_i32 = arith.constant 0 : i32
    %c0_i32_0 = arith.constant 0 : i32
    %c0_i32_1 = arith.constant 0 : i32
    return %c0_i32, %c0_i32_0 : i32, i32
  }
  func.func @transform_6(%arg0: i32) -> (i32, i32) {
    %c0_i32 = arith.constant 0 : i32
    %c0_i32_0 = arith.constant 0 : i32
    %c0_i32_1 = arith.constant 0 : i32
    return %c0_i32, %c0_i32_0 : i32, i32
  }
  func.func @transform_7(%arg0: i32) -> (i32, i32) {
    %c0_i32 = arith.constant 0 : i32
    %c0_i32_0 = arith.constant 0 : i32
    %c0_i32_1 = arith.constant 0 : i32
    return %c0_i32, %c0_i32_0 : i32, i32
  }
  func.func @transform_8(%arg0: i32) -> (i32, i32) {
    %c0_i32 = arith.constant 0 : i32
    %c0_i32_0 = arith.constant 0 : i32
    %c0_i32_1 = arith.constant 0 : i32
    return %c0_i32, %c0_i32_0 : i32, i32
  }
  func.func @transform_9(%arg0: i32) -> (i32, i32) {
    %c0_i32 = arith.constant 0 : i32
    %c0_i32_0 = arith.constant 0 : i32
    %c0_i32_1 = arith.constant 0 : i32
    return %c0_i32, %c0_i32_0 : i32, i32
  }
  func.func @transform_10(%arg0: i32) -> (i32, i32) {
    %c0_i32 = arith.constant 0 : i32
    %c0_i32_0 = arith.constant 0 : i32
    %c0_i32_1 = arith.constant 0 : i32
    return %c0_i32, %c0_i32_0 : i32, i32
  }
  func.func @transform_11(%arg0: i32) -> (i32, i32) {
    %c0_i32 = arith.constant 0 : i32
    %c0_i32_0 = arith.constant 0 : i32
    %c0_i32_1 = arith.constant 0 : i32
    return %c0_i32, %c0_i32_0 : i32, i32
  }
  func.func @transform_12(%arg0: i32) -> (i32, i32, i32) {
    %c0_i32 = arith.constant 0 : i32
    %c0_i32_0 = arith.constant 0 : i32
    %c0_i32_1 = arith.constant 0 : i32
    return %arg0, %c0_i32, %c0_i32_0 : i32, i32, i32
  }
}

</mosaic_0001>

<bundles_post_ra>
// kernel: tpu_custom_call.1
= control target key start
LH: loop header
LB: loop body
LE: loop exit
PB: predicated region body
PF: predicated region fallthrough
CT: control target
= control target key end

     0   :  { %s1321_s0 = inlined_call_operand.vmem [shape: bf16[2,16,256], index: 0, kind: input, shape index: {}]   ;;  %s1322_s1 = inlined_call_operand.vmem [shape: bf16[256,64], index: 1, kind: input, shape index: {}]   ;;  %s1323_s2 = inlined_call_operand.vmem [shape: f32[1,64], index: 2, kind: input, shape index: {}]   ;;  %s1324_s3 = inlined_call_operand.vmem [shape: f32[1,64], index: 3, kind: input, shape index: {}]   ;;  %s1325_s4 = inlined_call_operand.vmem [shape: bf16[64,64], index: 4, kind: input, shape index: {}]   ;;  %s1326_s5 = inlined_call_operand.vmem [shape: bf16[64,64], index: 5, kind: input, shape index: {}]   ;;  %s1327_s6 = inlined_call_operand.vmem [shape: bf16[64,64], index: 6, kind: input, shape index: {}]   ;;  %s1328_s7 = inlined_call_operand.vmem [shape: f32[1,64], index: 7, kind: input, shape index: {}]   ;;  %s1329_s8 = inlined_call_operand.vmem [shape: f32[1,64], index: 8, kind: input, shape index: {}]   ;;  %s1330_s9 = inlined_call_operand.vmem [shape: bf16[64,256], index: 9, kind: input, shape index: {}]   ;;  %s1331_s10 = inlined_call_operand.vmem [shape: f32[1,256], index: 10, kind: input, shape index: {}]   ;;  %s1332_s11 = inlined_call_operand.vmem [shape: f32[1,256], index: 11, kind: input, shape index: {}]   ;;  %s1333_s12 = inlined_call_operand.hbm [shape: f32[2,16,256], index: 12, kind: output, shape index: {}]  }
   0x1   :  { %v982_v0 = vld [vmem:[%s1322_s1 + $0x40] sm:$0xff]   ;;  %v984_v2 = vld [vmem:[%s1322_s1 + $0x48] sm:$0xff]   ;;  %v986_v4 = vld [vmem:[%s1322_s1 + $0x50] sm:$0xff]  }
   0x2   :  { %v983_v1 = vld [vmem:[%s1322_s1] sm:$0xff]   ;;  %888 = vmatprep.subr.bf16.mxu0 %v982_v0  ;;  %v985_v3 = vld [vmem:[%s1322_s1 + $0x8] sm:$0xff]   ;;  %v987_v5 = vld [vmem:[%s1322_s1 + $0x10] sm:$0xff]  }
   0x3   :  { %889 = vmatpush3.bf16.msra.mxu0 %v983_v1  ;;  %v988_v6 = vld [vmem:[%s1322_s1 + $0x58] sm:$0xff]   ;;  %v990_v8 = vld [vmem:[%s1322_s1 + $0x60] sm:$0xff]   ;;  %v992_v10 = vld [vmem:[%s1322_s1 + $0x68] sm:$0xff]  }
   0x4   :  { %890 = vmatprep.subr.bf16.mxu0 %v984_v2  ;;  %v989_v7 = vld [vmem:[%s1322_s1 + $0x18] sm:$0xff]   ;;  %v991_v9 = vld [vmem:[%s1322_s1 + $0x20] sm:$0xff]   ;;  %v993_v12 = vld [vmem:[%s1322_s1 + $0x28] sm:$0xff]  }
   0x5   :  { %v1000_v11 = vld [vmem:[%s1321_s0 + $0x4] ss:$8 sps:$4 sm:$0xff]   ;;  %v994_v13 = vld [vmem:[%s1322_s1 + $0x70] sm:$0xff]   ;;  %v996_v15 = vld [vmem:[%s1322_s1 + $0x78] sm:$0xff]  }
   0x6   :  { %227 = vmatprep.mubr.bf16.mxu0 %v1000_v11  ;;  %v995_v14 = vld [vmem:[%s1322_s1 + $0x30] sm:$0xff]   ;;  %v997_v16 = vld [vmem:[%s1322_s1 + $0x38] sm:$0xff]  }
   0x7   :  { %891 = vmatpush3.bf16.msra.mxu0 %v985_v3 }
   0x8   :  { %892 = vmatprep.subr.bf16.mxu0 %v986_v4 }
   0xb   :  { %893 = vmatpush3.bf16.msra.mxu0 %v987_v5 }
   0xc   :  { %894 = vmatprep.subr.bf16.mxu0 %v988_v6 }
   0xf   :  { %895 = vmatpush3.bf16.msra.mxu0 %v989_v7 }
  0x10   :  { %896 = vmatprep.subr.bf16.mxu0 %v990_v8 }
  0x13   :  { %897 = vmatpush3.bf16.msra.mxu0 %v991_v9 }
  0x14   :  { %898 = vmatprep.subr.bf16.mxu0 %v992_v10 }
  0x17   :  { %899 = vmatpush3.bf16.msra.mxu0 %v993_v12 }
  0x18   :  { %900 = vmatprep.subr.bf16.mxu0 %v994_v13 }
  0x1b   :  { %901 = vmatpush3.bf16.msra.mxu0 %v995_v14 }
  0x1c   :  { %902 = vmatprep.subr.bf16.mxu0 %v996_v15 }
  0x1d   :  { %17 = vsyncpa [#allocation3], 0  ;;  %v998_v17 = vld [vmem:[%s1321_s0] ss:$8 sps:$4 sm:$0xff]   ;;  %v1001_v18 = vld [vmem:[%s1321_s0 + $0x14] ss:$8 sps:$4 sm:$0xff]   ;;  %v270_v34 = vlaneseq }
  0x1e   :  { %v1003_v19 = vld [vmem:[%s1321_s0 + $0x10] ss:$8 sps:$4 sm:$0xff]   ;;  %v1004_v20 = vld [vmem:[%s1325_s4] sm:$0xff]   ;;  %v1005_v21 = vld [vmem:[%s1325_s4 + $0x8] sm:$0xff]   ;;  %vm401_vm5 = vcmask 523264  }
  0x1f   :  { %903 = vmatpush3.bf16.msra.mxu0 %v997_v16  ;;  %934 = vmatprep.subr.bf16.mxu1 %v1004_v20  ;;  %v1006_v22 = vld [vmem:[%s1325_s4 + $0x10] sm:$0xff]   ;;  %v1007_v23 = vld [vmem:[%s1325_s4 + $0x18] sm:$0xff]   ;;  %v1196_v24 = vld [vmem:[%s1326_s5] sm:$0xff]   ;;  %v1217_v41 = vshrl.u32 %v270_v34, 7 }
  0x20   :  { %935 = vmatpush3.bf16.msra.mxu1 %v1004_v20  ;;  %v1016_v25 = vld [vmem:[%s1330_s9] ss:$8 sps:$4 sm:$0xff]   ;;  %v1018_v26 = vld [vmem:[%s1330_s9 + $0x4] ss:$8 sps:$4 sm:$0xff]   ;;  %v1021_v27 = vld [vmem:[%s1330_s9 + $0x14] ss:$8 sps:$4 sm:$0xff]  }
  0x21   :  { %936 = vmatprep.subr.bf16.mxu1 %v1005_v21  ;;  %711 = vmatprep.subr.bf16.mxu0 %v1018_v26  ;;  %v1019_v28 = vld [vmem:[%s1330_s9 + $0x10] ss:$8 sps:$4 sm:$0xff]   ;;  %v856_v31 = vld [vmem:[%s1323_s2] ss:$0 sm:$0xff]  ;;  %v273_v46 = vadd.s32 16, %v1217_v41  ;;  %vm331_vm0 = vcmp.lt.s32.totalorder %v1217_v41, 1 }
  0x22   :  { %228 = vmatmul.mubr.bf16.vlgmr.msra.gmra.mrb[0].mxu0 %v998_v17  ;;  %v857_v35 = vld [vmem:[%s1324_s3] ss:$0 sm:$0xff]  ;;  %v272_v53 = vadd.s32 8, %v1217_v41  ;;  %vm348_vm1 = vcmp.lt.s32.totalorder %v1217_v41, 7  ;;  %v274_v60 = vadd.s32 24, %v1217_v41  ;;  %v279_v1 = vand.u32 15, %v1217_v41 }
  0x23   :  { %235 = vmatprep.mubr.bf16.mxu0 %v1001_v18  ;;  %712 = vmatpush1.bf16.msra.mxu0 %v1016_v25  ;;  %v293_v58 = vand.u32 15, %v273_v46  ;;  %v1015_v34 = vld [vmem:[%s1327_s6 + $0x18] sm:$0xff]  }
  0x24   :  { %937 = vmatpush3.bf16.msra.mxu1 %v1005_v21  ;;  %713 = vmatprep.subr.bf16.mxu0 %v1021_v27  ;;  %v286_v2 = vand.u32 15, %v272_v53  ;;  %v300_v5 = vand.u32 15, %v274_v60  ;;  %vm1233_vm3 = vcmp.eq.s32.totalorder %v279_v1, 0 }
  0x25   :  { %938 = vmatprep.subr.bf16.mxu1 %v1006_v22  ;;  %vm1229_vm2 = vcmp.eq.s32.totalorder %v293_v58, 0 }
  0x26   :  { %vm341_vm4 = vcmp.eq.s32.totalorder %v286_v2, 15  ;;  %vm343_vm6 = vcmp.eq.s32.totalorder %v300_v5, 15 }
  0x27   :  { %714 = vmatpush1.bf16.msra.mxu0 %v1019_v28  ;;  %v1009_v28 = vld [vmem:[%s1326_s5 + $0x8] sm:$0xff]  }
  0x28   :  { %939 = vmatpush3.bf16.msra.mxu1 %v1006_v22 }
  0x29   :  { %940 = vmatprep.subr.bf16.mxu1 %v1007_v23 }
  0x2a   :  { %236 = vmatmul.mubr.bf16.gmra.mrb[4].mxu0 %v1003_v19 }
  0x2c   :  { %941 = vmatpush3.bf16.msra.mxu1 %v1007_v23 }
  0x2d   :  { %946 = vmatprep.subr.bf16.mxu1 %v1196_v24 }
  0xf5   :  { %v904_v29 = vpop.f32.mrb[0].mxu0 }
  0xf6   :  { %v905_v30 = vpop.f32.mrb[1].mxu0 }
  0xf7   :  { %v906_v32 = vadd.f32 %v905_v30, %v904_v29  ;;  %v907_v33 = vpop.f32.mrb[2].mxu0  ;;  %v1010_v30 = vld [vmem:[%s1326_s5 + $0x10] sm:$0xff]  }
  0xf8   :  { %v908_v36 = vpop.f32.mrb[3].mxu0 }
  0xf9   :  { %v251_v37 = vmul.f32 %v906_v32, %v856_v31  ;;  %v909_v38 = vadd.f32 %v908_v36, %v907_v33  ;;  %v1012_v32 = vld [vmem:[%s1327_s6] sm:$0xff]   ;;  %v1014_v33 = vld [vmem:[%s1327_s6 + $0x10] sm:$0xff]  }
  0xfa   :  { %v1022_v36 = vld [vmem:[%s1330_s9 + $0x20] ss:$8 sps:$4 sm:$0xff]  }
  0xfb   :  { %v262_v39 = vadd.f32 %v857_v35, %v251_v37  ;;  %v252_v40 = vmul.f32 %v909_v38, %v856_v31  ;;  %v1027_v37 = vld [vmem:[%s1330_s9 + $0x34] ss:$8 sps:$4 sm:$0xff]   ;;  %v1025_v38 = vld [vmem:[%s1330_s9 + $0x30] ss:$8 sps:$4 sm:$0xff]  }
  0xfd   :  { %v266_v42 = vmax.f32 %v262_v39, 0.0  ;;  %v263_v43 = vadd.f32 %v857_v35, %v252_v40  ;;  %v910_v44 = vpop.f32.mrb[4].mxu0  ;;  %v1052_v39 = vmov 0   ;;  %v876_v40 = vld [vmem:[%s1328_s7] ss:$0 sm:$0xff] }
  0xfe   :  { %v911_v45 = vpop.f32.mrb[5].mxu0  ;;  %743 = vmatprep.mubr.bf16.mxu0 %v1052_v39 }
  0xff   :  { %v267_v47 = vmax.f32 %v263_v43, 0.0  ;;  %v912_v48 = vadd.f32 %v911_v45, %v910_v44  ;;  %v913_v49 = vpop.f32.mrb[6].mxu0  ;;  %v344_v50 = vrot.slane %v266_v42, 1  ;;  %v327_v52 = vrot.slane %v266_v42, 7  ;;  %v877_v43 = vld [vmem:[%s1329_s8] ss:$0 sm:$0xff] }
 0x100   :  { %v914_v51 = vpop.f32.mrb[7].mxu0 }
 0x101   :  { %v345_v54 = vrot.slane %v267_v47, 1  ;;  %v253_v55 = vmul.f32 %v912_v48, %v856_v31  ;;  %v915_v56 = vadd.f32 %v914_v51, %v913_v49  ;;  %v328_v57 = vrot.slane %v267_v47, 7 }
 0x102   :  { %v357_v59 = vpack.c.bf16 %v267_v47, %v266_v42 }
 0x103   :  { %v264_v61 = vadd.f32 %v857_v35, %v253_v55  ;;  %v254_v62 = vmul.f32 %v915_v56, %v856_v31  ;;  %v334_v63 = vsel %vm331_vm0, %v327_v52, %v328_v57  ;;  %v351_v0 = vsel %vm348_vm1, %v344_v50, %v345_v54  ;;  %v1011_v31 = vld [vmem:[%s1326_s5 + $0x18] sm:$0xff]  }
 0x105   :  { %v268_v3 = vmax.f32 %v264_v61, 0.0  ;;  %v265_v4 = vadd.f32 %v857_v35, %v254_v62  ;;  %v1024_v35 = vld [vmem:[%s1330_s9 + $0x24] ss:$8 sps:$4 sm:$0xff]   ;;  %v768_v61 = vsub.s32 0, %v1217_v41  ;;  %v764_v62 = vld [vmem:[%s1331_s10] sm:$0x3] }
 0x106   :  { %715 = vmatprep.subr.bf16.mxu0 %v1024_v35  ;;  %s1053_s10 = smov [#allocation2]  }
 0x107   :  { %v329_v6 = vrot.slane %v268_v3, 7  ;;  %v346_v7 = vrot.slane %v268_v3, 1  ;;  %v269_v8 = vmax.f32 %v265_v4, 0.0  ;;  %716 = vmatpush1.bf16.msra.mxu0 %v1022_v36  ;;  %v769_v1 = vrot.slane %v764_v62, %v768_v61 }
 0x108   :  { %717 = vmatprep.subr.bf16.mxu0 %v1027_v37 }
 0x109   :  { %v347_v11 = vrot.slane %v269_v8, 1  ;;  %v358_v12 = vpack.c.bf16 %v269_v8, %v268_v3  ;;  %v330_v13 = vrot.slane %v269_v8, 7  ;;  %v333_v14 = vsel %vm331_vm0, %v328_v57, %v329_v6 }
 0x10a   :  { %v338_v15 = vsel %vm1229_vm2, 0.0, %v333_v14  ;;  %v350_v16 = vsel %vm348_vm1, %v345_v54, %v346_v7 }
 0x10b   :  { %v335_v17 = vsel %vm331_vm0, %v330_v13, %v327_v52  ;;  %v332_v18 = vsel %vm331_vm0, %v329_v6, %v330_v13  ;;  %v354_v19 = vsel %vm341_vm4, 0.0, %v350_v16  ;;  %v349_v20 = vsel %vm348_vm1, %v346_v7, %v347_v11  ;;  %718 = vmatpush1.bf16.msra.mxu0 %v1025_v38 }
 0x10c   :  { %v336_v21 = vsel %vm1233_vm3, 0.0, %v335_v17  ;;  %v368_v22 = vpack.c.bf16 %v332_v18, %v338_v15  ;;  %v536_v23 = vpack.c.bf16 %v354_v19, %v351_v0  ;;  %v352_v25 = vsel %vm348_vm1, %v347_v11, %v344_v50  ;;  %v784_v0 = vld [vmem:[%s1332_s11] sm:$0x3]  ;;  %s825_s11 = sshll.u32 %s1053_s10, 4  ;;  %s826_s11 = int_to_ptr.vmem [resolvable:$true] %s825_s11 }
 0x10d   :  { %v367_v26 = vpack.c.bf16 %v334_v63, %v336_v21  ;;  %v356_v27 = vsel %vm343_vm6, 0.0, %v352_v25  ;;  %v772_v63 = vsub.s32 1, %v1217_v41  ;;  %v789_v3 = vrot.slane %v784_v0, %v768_v61  ;;  %s1028_s25 = scalar_lea.vmem %s826_s11, 1024  ;;  %p1033_p1 = scmp.lt.s32.totalorder %s826_s11, %s826_s11 }
 0x10e   :  { %v537_v29 = vpack.c.bf16 %v356_v27, %v349_v20  ;;  %p1029_p0 = scmp.ne.s32.totalorder %s826_s11, %s1028_s25  ;;  %p1034_p2 = scmp.lt.s32.totalorder %s1028_s25, %s1028_s25 }
 0x10f   :  { %942 = vmatprep.mubr.msk.bf16.mxu1 %vm401_vm5, %v367_v26  ;;  %v773_v2 = vrot.slane %v764_v62, %v772_v63  ;;  %v793_v5 = vrot.slane %v784_v0, %v772_v63 }
 0x110   :  { %943 = vmatmul.mubr.msk.bf16.vlgmr.msra.gmra.mrb[0].mxu1 %vm401_vm5, %v368_v22  ;;  %p1035_p3 = por %p1034_p2, %p1033_p1 }
 0x111   :  { %947 = vmatpush3.bf16.msra.mxu1 %v1196_v24  ;;  %954 = vmatprep.mubr.msk.bf16.mxu1 %vm401_vm5, %v357_v59  ;;  %v1013_v24 = vld [vmem:[%s1327_s6 + $0x8] sm:$0xff]  }
 0x112   :  { %948 = vmatprep.subr.bf16.mxu1 %v1009_v28  ;;  %p1036_p4 = pnand %p1035_p3, %p1029_p0 }
 0x115   :  { %949 = vmatpush3.bf16.msra.mxu1 %v1009_v28 }
 0x116   :  { %950 = vmatprep.subr.bf16.mxu1 %v1010_v30 }
 0x119   :  { %951 = vmatpush3.bf16.msra.mxu1 %v1010_v30 }
 0x11a   :  { %952 = vmatprep.subr.bf16.mxu1 %v1011_v31 }
 0x11d   :  { %953 = vmatpush3.bf16.msra.mxu1 %v1011_v31 }
 0x11e   :  { %958 = vmatprep.subr.bf16.mxu1 %v1012_v32 }
 0x120   :  { %955 = vmatmul.mubr.msk.bf16.vlgmr.msra.gmra.mrb[0].mxu1 %vm401_vm5, %v358_v12 }
 0x121   :  { %959 = vmatpush3.bf16.msra.mxu1 %v1012_v32  ;;  %966 = vmatprep.mubr.msk.bf16.mxu1 %vm401_vm5, %v536_v23 }
 0x122   :  { %960 = vmatprep.subr.bf16.mxu1 %v1013_v24 }
 0x125   :  { %961 = vmatpush3.bf16.msra.mxu1 %v1013_v24 }
 0x126   :  { %962 = vmatprep.subr.bf16.mxu1 %v1014_v33 }
 0x129   :  { %963 = vmatpush3.bf16.msra.mxu1 %v1014_v33 }
 0x12a   :  { %964 = vmatprep.subr.bf16.mxu1 %v1015_v34 }
 0x12d   :  { %965 = vmatpush3.bf16.msra.mxu1 %v1015_v34 }
 0x130   :  { %967 = vmatmul.mubr.msk.bf16.vlgmr.msra.gmra.mrb[0].mxu1 %vm401_vm5, %v537_v29 }
 0x203   :  { %v968_v42 = vpop.f32.mrb[0].mxu1 }
 0x204   :  { %v638_v44 = vmul.f32 %v968_v42, %v876_v40  ;;  %v610_v45 = vpop.f32.mrb[1].mxu1 }
 0x205   :  { %v636_v46 = vmul.f32 %v876_v40, %v610_v45  ;;  %v969_v47 = vpop.f32.mrb[2].mxu1 }
 0x206   :  { %v649_v48 = vadd.f32 %v877_v43, %v638_v44  ;;  %v639_v49 = vmul.f32 %v969_v47, %v876_v40  ;;  %v613_v50 = vpop.f32.mrb[3].mxu1 }
 0x207   :  { %v647_v51 = vadd.f32 %v877_v43, %v636_v46  ;;  %v637_v52 = vmul.f32 %v876_v40, %v613_v50 }
 0x208   :  { %v650_v53 = vadd.f32 %v877_v43, %v639_v49  ;;  %v653_v55 = vmax.f32 %v649_v48, 0.0 }
 0x209   :  { %v648_v54 = vadd.f32 %v877_v43, %v637_v52  ;;  %v651_v57 = vmax.f32 %v647_v51, 0.0 }
 0x20a   :  { %v654_v56 = vmax.f32 %v650_v53, 0.0 }
 0x20b   :  { %v652_v58 = vmax.f32 %v648_v54, 0.0 }
 0x20c   :  { %v656_v59 = vpack.c.bf16 %v654_v56, %v653_v55 }
 0x20d   :  { %v655_v60 = vpack.c.bf16 %v652_v58, %v651_v57 }
 0x20f   :  { %886 = vmatmul.mubr.msk.bf16.vlgmr.msra.gmra.mrb[8].mxu0 %vm401_vm5, %v655_v60 }
 0x210   :  { %753 = vmatprep.mubr.bf16.mxu0 %v1052_v39 }
 0x217   :  { %887 = vmatmul.mubr.msk.bf16.gmra.mrb[12].mxu0 %vm401_vm5, %v656_v59 }
 0x2e2   :  { %v745_v4 = vpop.f32.mrb[8].mxu0 }
 0x2e3   :  { %v776_v6 = vmul.f32 %v769_v1, %v745_v4  ;;  %v747_v7 = vpop.f32.mrb[9].mxu0 }
 0x2e4   :  { %v777_v8 = vmul.f32 %v773_v2, %v747_v7  ;;  %v749_v9 = vpop.f32.mrb[10].mxu0 }
 0x2e5   :  { %v796_v10 = vadd.f32 %v789_v3, %v776_v6  ;;  %v778_v11 = vmul.f32 %v769_v1, %v749_v9  ;;  %v751_v12 = vpop.f32.mrb[11].mxu0 }
 0x2e6   :  { %v797_v13 = vadd.f32 %v793_v5, %v777_v8  ;;  %v779_v14 = vmul.f32 %v773_v2, %v751_v12 }
 0x2e7   :  { %v804_v15 = vmax.f32 %v796_v10, 0.0  ;;  %v798_v41 = vadd.f32 %v789_v3, %v778_v11 }
 0x2e8   :  { %v805_v16 = vmax.f32 %v797_v13, 0.0  ;;  %v799_v17 = vadd.f32 %v793_v5, %v779_v14 }
 0x2e9   :  { %812 = vst [vmem:[#allocation2] sm:$0xff] %v804_v15  ;;  %v806_v18 = vmax.f32 %v798_v41, 0.0 }
 0x2ea   :  { %813 = vst [vmem:[#allocation2 + $0x8] sm:$0xff] %v805_v16  ;;  %v807_v19 = vmax.f32 %v799_v17, 0.0  ;;  %v755_v20 = vpop.f32.mrb[12].mxu0 }
 0x2eb   :  { %814 = vst [vmem:[#allocation2 + $0x10] sm:$0xff] %v806_v18  ;;  %v780_v21 = vmul.f32 %v769_v1, %v755_v20  ;;  %v757_v22 = vpop.f32.mrb[13].mxu0 }
 0x2ec   :  { %815 = vst [vmem:[#allocation2 + $0x18] sm:$0xff] %v807_v19  ;;  %v781_v23 = vmul.f32 %v773_v2, %v757_v22  ;;  %v759_v25 = vpop.f32.mrb[14].mxu0 }
 0x2ed   :  { %v800_v26 = vadd.f32 %v789_v3, %v780_v21  ;;  %v782_v27 = vmul.f32 %v769_v1, %v759_v25  ;;  %v761_v28 = vpop.f32.mrb[15].mxu0 }
 0x2ee   :  { %v801_v29 = vadd.f32 %v793_v5, %v781_v23  ;;  %v783_v30 = vmul.f32 %v773_v2, %v761_v28 }
 0x2ef   :  { %v808_v31 = vmax.f32 %v800_v26, 0.0  ;;  %v802_v32 = vadd.f32 %v789_v3, %v782_v27 }
 0x2f0   :  { %v809_v24 = vmax.f32 %v801_v29, 0.0  ;;  %v803_v33 = vadd.f32 %v793_v5, %v783_v30 }
 0x2f1   :  { %816 = vst [vmem:[#allocation2 + $0x20] sm:$0xff] %v808_v31  ;;  %v810_v34 = vmax.f32 %v802_v32, 0.0 }
 0x2f2   :  { %817 = vst [vmem:[#allocation2 + $0x28] sm:$0xff] %v809_v24  ;;  %v811_v35 = vmax.f32 %v803_v33, 0.0 }
 0x2f3   :  { %818 = vst [vmem:[#allocation2 + $0x30] sm:$0xff] %v810_v34 }
 0x2f4   :  { %819 = vst [vmem:[#allocation2 + $0x38] sm:$0xff] %v811_v35 }
 0x2f5   :  { %1039 = shalt.err (!%p1036_p4)
}
 0x2f6   :  { %s1040_s28 = scalar_lea.hbm %s1333_s12, 1024 }
 0x2f7   :  { %p1041_p5 = scmp.ne.s32.totalorder %s1333_s12, %s1040_s28  ;;  %p1044_p6 = scmp.lt.u32.totalorder %s1040_s28, %s1333_s12 }
 0x2f9   :  { %p1046_p7 = pnand %p1044_p6, %p1041_p5 }
 0x2fb   :  { %1049 = shalt.err (!%p1046_p7)
}
 0x2fc   :  { %s1054_s14 = smov 256   ;;  %s1055_s5 = smov 16  }
 0x2fd   :  { %831 = dma.vmem_to_hbm [thread:$0]  %s826_s11, 1024, %s1333_s12, [#allocation3], %s1054_s14, %s1054_s14, %s1055_s5  }
 0x2fe   :  { %1050 = dma.done.wait [#allocation3], 1024  }
 0x2ff   :  { %1051 = vsyncadd [#allocation3], 4294966272 }
 0x300   :  { %835 = vsyncpa [#allocation3], 1 }

</bundles_post_ra>
